<compile_context>
chip_gen: v6e
topology: v6e:2x2x1
jax: 0.10.0
libtpu: 0.0.40
codegen_flags: <defaults>
</compile_context>

<pallas_src>
import math

import jax
import jax.numpy as jnp
from jax.experimental import pallas as pl
from jax.experimental.pallas import tpu as pltpu

IN_DIM, HID_DIM, OUT_DIM = 5, 20, 4
LANES = 128          # lane-dense padded output width
PACK_ROWS = 56       # packed params rows (multiple of 8)
# packed layout (rows of the (56, 128) buffer):
#   rows  0: 5  cols 0:20  -> W1 (5, 20)
#   row   5    cols 0:20  -> b1
#   rows  8:28 cols 0:20  -> W2 (20, 20)
#   row  28    cols 0:20  -> b2
#   rows 32:52 cols 0:4   -> W3 (20, 4)   (zero-padded to 128 output lanes)
#   row  52    cols 0:4   -> b3


def mlp_kernel(x_ref, p_ref, o_ref):
    x = x_ref[...]                                   # (bm, 5)  f32
    p = p_ref[...]                                   # (56, 128) f32, resident

    w1 = p[0:5, 0:HID_DIM]
    b1 = p[5:6, 0:HID_DIM]
    w2 = p[8:28, 0:HID_DIM]
    b2 = p[28:29, 0:HID_DIM]
    w3 = p[32:52, :]                                 # (20, 128) lane-dense
    b3 = p[52:53, :]                                 # (1, 128)

    h = jnp.dot(x, w1, preferred_element_type=jnp.float32) + b1
    h = jnp.maximum(h, 0.0)                          # (bm, 20) ReLU
    h = jnp.dot(h, w2, preferred_element_type=jnp.float32) + b2
    h = jnp.maximum(h, 0.0)                          # (bm, 20) ReLU
    o = jnp.dot(h, w3, preferred_element_type=jnp.float32) + b3
    o_ref[...] = o.astype(o_ref.dtype)               # (bm, 128) unmasked store


def pack_params(params):
    """Pack (W1,b1),(W2,b2),(W3,b3) into one zero-padded (56, 128) buffer."""
    (w1, b1), (w2, b2), (w3, b3) = params
    p = jnp.zeros((PACK_ROWS, LANES), jnp.float32)
    p = p.at[0:5, 0:HID_DIM].set(w1)
    p = p.at[5, 0:HID_DIM].set(b1.reshape(-1))
    p = p.at[8:28, 0:HID_DIM].set(w2)
    p = p.at[28, 0:HID_DIM].set(b2.reshape(-1))
    p = p.at[32:52, 0:OUT_DIM].set(w3)
    p = p.at[52, 0:OUT_DIM].set(b3.reshape(-1))
    return p


def _round_up(n, m):
    return ((n + m - 1) // m) * m


def mlp_forward(x, packed, *, bm=512):
    """x: (B, 5) f32, packed: (56, 128) f32 -> (B, 4) f32."""
    B, F = x.shape
    bm = min(bm, _round_up(B, 8))          # small batches: one 8-aligned block
    Bp = _round_up(B, bm)
    if Bp != B:
        x = jnp.pad(x, ((0, Bp - B), (0, 0)))
    grid = (Bp // bm,)

    out_padded = pl.pallas_call(
        mlp_kernel,
        out_shape=jax.ShapeDtypeStruct((Bp, LANES), jnp.float32),
        grid_spec=pltpu.PrefetchScalarGridSpec(
            num_scalar_prefetch=0,
            grid=grid,
            in_specs=[
                pl.BlockSpec((bm, F), lambda i: (i, 0)),          # x tile
                pl.BlockSpec((PACK_ROWS, LANES), lambda i: (0, 0)),  # params (resident)
            ],
            out_specs=pl.BlockSpec((bm, LANES), lambda i: (i, 0)),
        ),
        compiler_params=pltpu.CompilerParams(
            dimension_semantics=("parallel",)),    # v7x: shard batch over 2 TCs
    )(x, packed)

    return out_padded[:B, :OUT_DIM]


def init_linear(key, fan_in, fan_out):
    """Deterministic init mimicking PyTorch nn.Linear defaults
    (uniform +/- 1/sqrt(fan_in)). Weights stored as (in, out) so y = x @ W."""
    kw, kb = jax.random.split(key)
    bound = 1.0 / math.sqrt(fan_in)
    w = jax.random.uniform(kw, (fan_in, fan_out), jnp.float32,
                           minval=-bound, maxval=bound)
    b = jax.random.uniform(kb, (1, fan_out), jnp.float32,
                           minval=-bound, maxval=bound)
    return w, b


def reference_forward(x, params):
    (w1, b1), (w2, b2), (w3, b3) = params
    h = jnp.maximum(x @ w1 + b1, 0.0)
    h = jnp.maximum(h @ w2 + b2, 0.0)
    return h @ w3 + b3


if __name__ == "__main__":
    key = jax.random.PRNGKey(0)
    k_x, k_x2, k1, k2, k3 = jax.random.split(key, 5)

    params = (
        init_linear(k1, IN_DIM, HID_DIM),
        init_linear(k2, HID_DIM, HID_DIM),
        init_linear(k3, HID_DIM, OUT_DIM),
    )
    packed = pack_params(params)

    # Small batch (matches the RL use case of a handful of states).
    batch = 8
    x = jax.random.normal(k_x, (batch, IN_DIM), jnp.float32)
    out = jax.block_until_ready(mlp_forward(x, packed))
    ref = reference_forward(x, params)
    assert out.shape == (batch, OUT_DIM)
    assert jnp.allclose(out, ref, atol=1e-5, rtol=1e-5)

    # Larger batch to exercise the multi-step grid + padding path.
    batch2 = 1040
    x2 = jax.random.normal(k_x2, (batch2, IN_DIM), jnp.float32)
    out2 = jax.block_until_ready(mlp_forward(x2, packed))
    ref2 = reference_forward(x2, params)
    assert out2.shape == (batch2, OUT_DIM)
    assert jnp.allclose(out2, ref2, atol=1e-5, rtol=1e-5)

    print("KERNEL_OK")
</pallas_src>

<mosaic_0001>
module attributes {stable_mosaic.version = 11 : i64} {
  func.func @mlp_kernel(%arg0: i32, %arg1: memref<8x5xf32, #tpu.memory_space<vmem>>, %arg2: memref<56x128xf32, #tpu.memory_space<vmem>>, %arg3: memref<8x128xf32, #tpu.memory_space<vmem>>) attributes {dimension_semantics = [#tpu.dimension_semantics<parallel>], iteration_bounds = array<i64: 1>, scalar_prefetch = 0 : i64, scratch_operands = 0 : i64, tpu.core_type = #tpu.core_type<tc>, window_params = [{transform_indices = @transform_0, window_bounds = array<i64: 8, 5>}, {pipeline_mode = #tpu.pipeline_mode<synchronous>, transform_indices = @transform_1, window_bounds = array<i64: 56, 128>}, {transform_indices = @transform_2, window_bounds = array<i64: 8, 128>}]} {
    %c0 = arith.constant 0 : index
    %c0_0 = arith.constant 0 : index
    %0 = vector.load %arg1[%c0, %c0_0] : memref<8x5xf32, #tpu.memory_space<vmem>>, vector<8x5xf32>
    %c0_1 = arith.constant 0 : index
    %c0_2 = arith.constant 0 : index
    %1 = vector.load %arg2[%c0_1, %c0_2] : memref<56x128xf32, #tpu.memory_space<vmem>>, vector<56x128xf32>
    %2 = vector.extract_strided_slice %1 {offsets = [0, 0], sizes = [5, 20], strides = [1, 1]} : vector<56x128xf32> to vector<5x20xf32>
    %3 = vector.extract_strided_slice %1 {offsets = [5, 0], sizes = [1, 20], strides = [1, 1]} : vector<56x128xf32> to vector<1x20xf32>
    %4 = vector.extract_strided_slice %1 {offsets = [8, 0], sizes = [20, 20], strides = [1, 1]} : vector<56x128xf32> to vector<20x20xf32>
    %5 = vector.extract_strided_slice %1 {offsets = [28, 0], sizes = [1, 20], strides = [1, 1]} : vector<56x128xf32> to vector<1x20xf32>
    %6 = vector.extract_strided_slice %1 {offsets = [32, 0], sizes = [20, 128], strides = [1, 1]} : vector<56x128xf32> to vector<20x128xf32>
    %7 = vector.extract_strided_slice %1 {offsets = [52, 0], sizes = [1, 128], strides = [1, 1]} : vector<56x128xf32> to vector<1x128xf32>
    %cst = arith.constant dense<0.000000e+00> : vector<8x20xf32>
    %8 = tpu.matmul %0, %2, %cst {dimension_numbers = #tpu.dot_dimension_numbers<[1], [0], [0], [1], [0, 0, 1, 1], [], []>} : vector<8x5xf32>, vector<5x20xf32>, vector<8x20xf32> -> vector<8x20xf32>
    %9 = vector.broadcast %3 : vector<1x20xf32> to vector<8x20xf32>
    %10 = arith.addf %8, %9 : vector<8x20xf32>
    %cst_3 = arith.constant 0.000000e+00 : f32
    %11 = vector.broadcast %cst_3 : f32 to vector<8x20xf32>
    %12 = arith.maximumf %10, %11 : vector<8x20xf32>
    %cst_4 = arith.constant dense<0.000000e+00> : vector<8x20xf32>
    %13 = tpu.matmul %12, %4, %cst_4 {dimension_numbers = #tpu.dot_dimension_numbers<[1], [0], [0], [1], [0, 0, 1, 1], [], []>} : vector<8x20xf32>, vector<20x20xf32>, vector<8x20xf32> -> vector<8x20xf32>
    %14 = vector.broadcast %5 : vector<1x20xf32> to vector<8x20xf32>
    %15 = arith.addf %13, %14 : vector<8x20xf32>
    %cst_5 = arith.constant 0.000000e+00 : f32
    %16 = vector.broadcast %cst_5 : f32 to vector<8x20xf32>
    %17 = arith.maximumf %15, %16 : vector<8x20xf32>
    %cst_6 = arith.constant dense<0.000000e+00> : vector<8x128xf32>
    %18 = tpu.matmul %17, %6, %cst_6 {dimension_numbers = #tpu.dot_dimension_numbers<[1], [0], [0], [1], [0, 0, 1, 1], [], []>} : vector<8x20xf32>, vector<20x128xf32>, vector<8x128xf32> -> vector<8x128xf32>
    %19 = vector.broadcast %7 : vector<1x128xf32> to vector<8x128xf32>
    %20 = arith.addf %18, %19 : vector<8x128xf32>
    %c0_7 = arith.constant 0 : index
    %c0_8 = arith.constant 0 : index
    %21 = vector.load %arg3[%c0_7, %c0_8] : memref<8x128xf32, #tpu.memory_space<vmem>>, vector<8x128xf32>
    tpu.vector_store %arg3[%c0_7, %c0_8], %20 {strides = array<i32>} : memref<8x128xf32, #tpu.memory_space<vmem>>, vector<8x128xf32>,
    return
  }
  func.func @transform_0(%arg0: i32) -> (i32, i32) {
    %c0_i32 = arith.constant 0 : i32
    %c0_i32_0 = arith.constant 0 : i32
    return %arg0, %c0_i32 : i32, i32
  }
  func.func @transform_1(%arg0: i32) -> (i32, i32) {
    %c0_i32 = arith.constant 0 : i32
    %c0_i32_0 = arith.constant 0 : i32
    %c0_i32_1 = arith.constant 0 : i32
    return %c0_i32, %c0_i32_0 : i32, i32
  }
  func.func @transform_2(%arg0: i32) -> (i32, i32) {
    %c0_i32 = arith.constant 0 : i32
    %c0_i32_0 = arith.constant 0 : i32
    return %arg0, %c0_i32 : i32, i32
  }
}

</mosaic_0001>

<bundles_post_ra>
// kernel: tpu_custom_call.1
= control target key start
LH: loop header
LB: loop body
LE: loop exit
PB: predicated region body
PF: predicated region fallthrough
CT: control target
= control target key end

     0   :  { %7 = vsyncpa [#allocation3], 0  ;;  %s456_s0 = inlined_call_operand.hbm [shape: f32[8,5], index: 0, kind: input, shape index: {}]   ;;  %s457_s1 = inlined_call_operand.hbm [shape: f32[56,128], index: 1, kind: input, shape index: {}]   ;;  %s458_s2 = inlined_call_operand.hbm [shape: f32[8,128], index: 2, kind: output, shape index: {}]  }
   0x1   :  { %8 = vsyncpa [#allocation6], 0 }
   0x2   :  { %9 = vsyncpa [#allocation4], 0  ;;  %s421_s9 = smov [#allocation2]   ;;  %s422_s11 = smov [#allocation5]  }
   0x3   :  { %s16_s10 = sshll.u32 %s421_s9, 4  ;;  %s25_s12 = sshll.u32 %s422_s11, 4  ;;  %s17_s10 = int_to_ptr.vmem [resolvable:$true] %s16_s10  ;;  %s26_s12 = int_to_ptr.vmem [resolvable:$true] %s25_s12 }
   0x4   :  { %s363_s13 = scalar_lea.vmem %s17_s10, 128  ;;  %p368_p1 = scmp.lt.s32.totalorder %s17_s10, %s17_s10 }
   0x5   :  { %p364_p0 = scmp.ne.s32.totalorder %s17_s10, %s363_s13  ;;  %p369_p2 = scmp.lt.s32.totalorder %s363_s13, %s363_s13 }
   0x7   :  { %p370_p3 = por %p369_p2, %p368_p1 }
   0x9   :  { %p371_p4 = pnand %p370_p3, %p364_p0 }
   0xb   :  { %374 = shalt.err (!%p371_p4)
}
   0xc   :  { %19 = dma.hbm_to_vmem [thread:$0]  %s456_s0, 128, %s17_s10, [#allocation3]  }
   0xd   :  { %s383_s16 = scalar_lea.vmem %s26_s12, 896  ;;  %p388_p6 = scmp.lt.s32.totalorder %s26_s12, %s26_s12 }
   0xe   :  { %p384_p5 = scmp.ne.s32.totalorder %s26_s12, %s383_s16  ;;  %p389_p7 = scmp.lt.s32.totalorder %s383_s16, %s383_s16 }
  0x10   :  { %p390_p8 = por %p389_p7, %p388_p6 }
  0x12   :  { %p391_p9 = pnand %p390_p8, %p384_p5 }
  0x14   :  { %394 = shalt.err (!%p391_p9)
}
  0x15   :  { %s423_s17 = smov 128   ;;  %s424_s18 = smov 8  }
  0x16   :  { %31 = dma.hbm_to_vmem [thread:$0]  %s457_s1, 896, %s26_s12, [#allocation6], %s423_s17, %s423_s17, %s424_s18  }
  0x17   :  { %415 = dma.done.wait [#allocation3], 128  }
  0x18   :  { %416 = vsyncadd [#allocation3], 4294967168 }
  0x19   :  { %417 = dma.done.wait [#allocation6], 896  }
  0x1a   :  { %418 = vsyncadd [#allocation6], 4294966400  ;;  %v425_v0 = vmov 0.0   ;;  %vm426_vm0 = vmmov 0   ;;  %vm54_vm1 = vcmask 1044480   ;;  %vm50_vm2 = vcmask 39936  }
  0x1b   :  { %325 = vmatprep.subr.mxu0 %v425_v0  ;;  %327 = vmatprep.mubr.msk.f32.mxu0 %vm426_vm0, %v425_v0  ;;  %v39_v1 = vld [vmem:[#allocation5] sm:$0xff]  ;;  %v38_v2 = vld [vmem:[#allocation2] sm:$0xff]  ;;  %vm137_vm3 = vcmask 1043456   ;;  %v41_v4 = vld [vmem:[#allocation5 + $0x10] sm:$0xff]  ;;  %v46_v6 = vlaneseq  ;;  %vm133_vm4 = vcmask 162816   ;;  %s427_s0 = smov [#allocation7]  }
  0x1c   :  { %330 = vmatprep.subr.mxu1 %v425_v0  ;;  %336 = vmatprep.mubr.msk.f32.mxu1 %vm426_vm0, %v425_v0  ;;  %v42_v3 = vld [vmem:[#allocation5 + $0x18] sm:$0xff]  ;;  %v40_v5 = vld [vmem:[#allocation5 + $0x8] sm:$0xff]  ;;  %v45_v14 = vld [vmem:[#allocation5 + $0x30] sm:$0xff]  ;;  %s299_s1 = sshll.u32 %s427_s0, 4  ;;  %s300_s1 = int_to_ptr.vmem [resolvable:$true] %s299_s1 }
  0x1d   :  { %326 = vmatpush3.msk.msra.mxu0 %vm54_vm1, %v39_v1  ;;  %331 = vmatpush3.msk.msra.mxu1 %vm137_vm3, %v42_v3  ;;  %v47_v7 = vshrl.u32 %v46_v6, 7  ;;  %v44_v15 = vld [vmem:[#allocation5 + $0x28] sm:$0xff]  ;;  %v43_v16 = vld [vmem:[#allocation5 + $0x20] sm:$0xff]  ;;  %s395_s21 = scalar_lea.vmem %s300_s1, 128  ;;  %p400_p11 = scmp.lt.s32.totalorder %s300_s1, %s300_s1 }
  0x1e   :  { %328 = vmatmul.mubr.msk.f32.vlgmr.msra.gmra.mxu0 %vm50_vm2, %v38_v2  ;;  %339 = vmatprep.subr.mxu0 %v425_v0  ;;  %p396_p10 = scmp.ne.s32.totalorder %s300_s1, %s395_s21  ;;  %p401_p12 = scmp.lt.s32.totalorder %s395_s21, %s395_s21 }
  0x1f   :  { %345 = vmatprep.mubr.msk.f32.mxu0 %vm426_vm0, %v425_v0  ;;  %332 = vmatprep.subr.mxu1 %v425_v0  ;;  %v48_v8 = vsub.s32 5, %v47_v7  ;;  %v131_v17 = vsub.s32 4, %v47_v7 }
  0x20   :  { %333 = vmatpush3.msra.mxu1 %v41_v4  ;;  %340 = vmatpush3.msk.msra.mxu0 %vm137_vm3, %v45_v14  ;;  %p402_p13 = por %p401_p12, %p400_p11 }
  0x21   :  { %334 = vmatprep.subr.mxu1 %v425_v0  ;;  %v49_v9 = vrot.slane %v39_v1, %v48_v8  ;;  %341 = vmatprep.subr.mxu0 %v425_v0  ;;  %v132_v18 = vrot.slane %v42_v3, %v131_v17  ;;  %v215_v23 = vrot.slane %v45_v14, %v131_v17 }
  0x22   :  { %335 = vmatpush3.msra.mxu1 %v40_v5  ;;  %342 = vmatpush3.msra.mxu0 %v44_v15  ;;  %p403_p0 = pnand %p402_p13, %p396_p10 }
  0x23   :  { %343 = vmatprep.subr.mxu0 %v425_v0 }
  0x24   :  { %344 = vmatpush3.msra.mxu0 %v43_v16 }
  0xde   :  { %v124_v10 = vpop.f32.mrf.mxu0 }
  0xdf   :  { %v125_v11 = vadd.f32 %v124_v10, %v49_v9 }
  0xe0   :  { %v329_v12 = vpop.f32.mrf.mxu0 }
  0xe1   :  { %v128_v13 = vmax.f32 %v125_v11, 0.0 }
  0xe3   :  { %337 = vmatmul.mubr.msk.f32.vlgmr.msra.gmra.mxu1 %vm133_vm4, %v128_v13 }
 0x1a3   :  { %v207_v19 = vpop.f32.mrf.mxu1 }
 0x1a4   :  { %v208_v20 = vadd.f32 %v207_v19, %v132_v18 }
 0x1a5   :  { %v338_v21 = vpop.f32.mrf.mxu1 }
 0x1a6   :  { %v211_v22 = vmax.f32 %v208_v20, 0.0 }
 0x1a8   :  { %346 = vmatmul.mubr.msk.f32.vlgmr.msra.gmra.mxu0 %vm133_vm4, %v211_v22 }
 0x268   :  { %v288_v24 = vpop.f32.mrf.mxu0 }
 0x269   :  { %v289_v25 = vadd.f32 %v288_v24, %v215_v23 }
 0x26a   :  { %v347_v26 = vpop.f32.mrf.mxu0 }
 0x26b   :  { %292 = vst [vmem:[#allocation7] sm:$0xff] %v289_v25 }
 0x26c   :  { %406 = shalt.err (!%p403_p0)
}
 0x26d   :  { %302 = dma.vmem_to_hbm [thread:$0]  %s300_s1, 128, %s458_s2, [#allocation4]  }
 0x26e   :  { %419 = dma.done.wait [#allocation4], 128  }
 0x26f   :  { %420 = vsyncadd [#allocation4], 4294967168 }
 0x270   :  { %306 = vsyncpa [#allocation3], 1 }
 0x271   :  { %307 = vsyncpa [#allocation6], 1 }
 0x272   :  { %308 = vsyncpa [#allocation4], 1 }

</bundles_post_ra>
